<compile_context>
chip_gen: v7x
topology: tpu7x:2x2x1
jax: 0.10.0
libtpu: 0.0.40
codegen_flags: <defaults>
</compile_context>

<pallas_src>
import jax
import jax.numpy as jnp
from jax import lax
from jax.experimental import pallas as pl
from jax.experimental.pallas import tpu as pltpu  # noqa: F401  (TPU backend)

# ---- problem sizes (small, consistent with the module) ----------------------
B = 2
DIM_IN = 4
DIM_OUT = 8
H = W = 16
HW = H * W
NPIX = B * HW                       # 512 : batch merged into the lane axis
RATE = 1
DILATIONS = (6 * RATE, 12 * RATE, 18 * RATE)
PAD = max(DILATIONS)                # pad once with the largest dilation (18)
BN_EPS = 1e-5

K_COLS = DIM_IN + 3 * 9 * DIM_IN    # 112 : [x | im2col d=6 | im2col d=12 | im2col d=18]
K_PACK = 128                        # contraction dim padded to one full lane tile
N_BR = 5 * DIM_OUT                  # 40  : rows of the block-diagonal branch weight


# ---- the fused ASPP kernel (single invocation, no grid) ----------------------
def aspp_kernel(cols_ref, wbr_ref, wcat_ref, bcat_ref, o_ref):
    """Fused ASPP forward.

    cols_ref : (128, 512) f32  [x | im2col taps | ones-row | zero-pad], batch in lanes
    wbr_ref  : (40, 128)  f32  block-diagonal branch weights (BN folded),
                               branch biases in column 112
    wcat_ref : (8, 40)    f32  conv_cat 1x1 weights (transposed, BN folded)
    bcat_ref : (8, 1)     f32  conv_cat bias column (BN folded)
    o_ref    : (B, 8, 256) f32 NCHW-flat output (lane-dense stores)
    """
    cols = cols_ref[...]                                  # (128, 512)
    wbr = wbr_ref[...]                                    # (40, 128)
    wcat = wcat_ref[...]                                  # (8, 40)
    b_c = bcat_ref[...]                                   # (8, 1)

    # One MXU push for all 4 spatial branches + branch5 per-pixel 1x1,
    # both batch elements at once (biases folded via the ones-row).
    z = jnp.dot(wbr, cols, preferred_element_type=jnp.float32)     # (40, 512)
    zb = jnp.maximum(z[0:4 * DIM_OUT, :], 0.0)                     # (32, 512) branches 1-4

    # Branch 5: global average pool -> 1x1 -> ReLU.  mean(conv(x)) == conv(mean(x));
    # the bilinear (align_corners=True) 1x1 -> HxW upsample is a broadcast,
    # realized here as a per-batch lane select.
    zg = z[4 * DIM_OUT:N_BR, :]                                    # (8, 512)
    lane = lax.broadcasted_iota(jnp.int32, (DIM_OUT, NPIX), 1)
    g_full = jnp.zeros((DIM_OUT, NPIX), jnp.float32)
    for b in range(B):                                             # B=2, unrolled
        g_b = jnp.maximum(
            jnp.mean(zg[:, b * HW:(b + 1) * HW], axis=1, keepdims=True), 0.0)  # (8, 1)
        g_full = jnp.where((lane >= b * HW) & (lane < (b + 1) * HW), g_b, g_full)

    # conv_cat over [br1, br2, br3, br4, broadcast(pooled)] -> one K=40 matmul.
    cat = jnp.concatenate([zb, g_full], axis=0)                    # (40, 512)
    res = jnp.maximum(
        jnp.dot(wcat, cat, preferred_element_type=jnp.float32) + b_c, 0.0)     # (8, 512)

    for b in range(B):                                             # unmasked (8,256) stores
        o_ref[b] = res[:, b * HW:(b + 1) * HW]


# ---- wrapper -----------------------------------------------------------------
def _im2col(xpad, d):
    """9 dilated taps of a 3x3 conv, concatenated along channels -> (B, 36, H*W)."""
    taps = []
    for i in range(3):
        for j in range(3):
            oh = PAD + (i - 1) * d
            ow = PAD + (j - 1) * d
            taps.append(xpad[:, :, oh:oh + H, ow:ow + W])          # (B, Cin, H, W)
    return jnp.concatenate(taps, axis=1).reshape(B, 9 * DIM_IN, HW)


def aspp_forward(x_nchw, packed):
    """x_nchw: (B, Cin, H, W); packed: (wbr, wcat, bcat) from pack_params."""
    wbr, wcat, bcat = packed
    x = x_nchw.astype(jnp.float32)
    xpad = jnp.pad(x, ((0, 0), (0, 0), (PAD, PAD), (PAD, PAD)))    # (B, Cin, 52, 52)
    cols_b = jnp.concatenate(
        [x.reshape(B, DIM_IN, HW)] + [_im2col(xpad, d) for d in DILATIONS],
        axis=1)                                                    # (B, 112, 256)
    # Merge batch into the lane axis and pad the contraction dim to 128:
    # row 112 = ones (folds the branch biases), rows 113..127 = zeros.
    cols = jnp.transpose(cols_b, (1, 0, 2)).reshape(K_COLS, NPIX)  # (112, 512)
    cols = jnp.concatenate(
        [cols,
         jnp.ones((1, NPIX), jnp.float32),
         jnp.zeros((K_PACK - K_COLS - 1, NPIX), jnp.float32)], axis=0)  # (128, 512)

    out = pl.pallas_call(
        aspp_kernel,
        out_shape=jax.ShapeDtypeStruct((B, DIM_OUT, HW), jnp.float32),
    )(cols, wbr, wcat, bcat)
    # Output is already NCHW-flat; splitting the trailing dim is a free reshape.
    return out.reshape(B, DIM_OUT, H, W)


aspp_forward_jit = jax.jit(aspp_forward)


# ---- parameter packing (block-diagonal branch weight, biases folded) ----------
def pack_params(params):
    (w1, b1, w2, b2, w3, b3, w4, b4, w5, b5, wc, bc) = params
    wbr = jnp.zeros((N_BR, K_PACK), jnp.float32)
    wbr = wbr.at[0:DIM_OUT, 0:DIM_IN].set(w1.T)                        # branch1 (1x1)
    col = DIM_IN
    for k, w in enumerate((w2, w3, w4)):                               # dilated 3x3 branches
        r0 = (k + 1) * DIM_OUT
        wbr = wbr.at[r0:r0 + DIM_OUT, col:col + 9 * DIM_IN].set(
            w.reshape(9 * DIM_IN, DIM_OUT).T)
        col += 9 * DIM_IN
    wbr = wbr.at[4 * DIM_OUT:5 * DIM_OUT, 0:DIM_IN].set(w5.T)          # branch5 (1x1)
    # Branch biases ride in column 112 (matched by the ones-row of cols).
    b_all = jnp.concatenate([b1.reshape(-1), b2.reshape(-1), b3.reshape(-1),
                             b4.reshape(-1), b5.reshape(-1)], axis=0)  # (40,)
    wbr = wbr.at[:, K_COLS].set(b_all)
    wcat = wc.reshape(5 * DIM_OUT, DIM_OUT).T                          # (8, 40)
    bcat = bc.reshape(DIM_OUT, 1)                                      # (8, 1)
    return wbr, wcat, bcat


# ---- deterministic parameter init with BN folded (inference mode) ------------
def init_params(key):
    keys = jax.random.split(key, 40)
    it = iter(keys)

    def nrm(shape, scale=0.2):
        return scale * jax.random.normal(next(it), shape, jnp.float32)

    def uni(shape, lo, hi):
        return jax.random.uniform(next(it), shape, jnp.float32, lo, hi)

    def folded(w_shape):
        w = nrm(w_shape)
        b = nrm((DIM_OUT,))
        gamma = uni((DIM_OUT,), 0.5, 1.5)
        beta = nrm((DIM_OUT,))
        mean = nrm((DIM_OUT,))
        var = uni((DIM_OUT,), 0.5, 1.5)
        scale = gamma / jnp.sqrt(var + BN_EPS)
        return w * scale, ((b - mean) * scale + beta).reshape(1, DIM_OUT)

    params = []
    params += list(folded((DIM_IN, DIM_OUT)))          # branch1 (1x1)
    params += list(folded((3, 3, DIM_IN, DIM_OUT)))    # branch2 (3x3, d=6)
    params += list(folded((3, 3, DIM_IN, DIM_OUT)))    # branch3 (3x3, d=12)
    params += list(folded((3, 3, DIM_IN, DIM_OUT)))    # branch4 (3x3, d=18)
    params += list(folded((DIM_IN, DIM_OUT)))          # branch5 (1x1 on pooled)
    params += list(folded((5, DIM_OUT, DIM_OUT)))      # conv_cat (1x1, 5*Cout in)
    return tuple(params)


# ---- pure-JAX reference (for correctness check) -------------------------------
def aspp_reference(x_nchw, params):
    (w1, b1, w2, b2, w3, b3, w4, b4, w5, b5, wc, bc) = params
    x = jnp.transpose(x_nchw, (0, 2, 3, 1)).astype(jnp.float32)
    dn = ('NHWC', 'HWIO', 'NHWC')

    def conv1x1(inp, w, b):
        return lax.conv_general_dilated(
            inp, w.reshape(1, 1, *w.shape), (1, 1), 'VALID',
            dimension_numbers=dn) + b.reshape(1, 1, 1, -1)

    def conv3x3(inp, w, b, d):
        return lax.conv_general_dilated(
            inp, w, (1, 1), [(d, d), (d, d)], rhs_dilation=(d, d),
            dimension_numbers=dn) + b.reshape(1, 1, 1, -1)

    br1 = jax.nn.relu(conv1x1(x, w1, b1))
    br2 = jax.nn.relu(conv3x3(x, w2, b2, DILATIONS[0]))
    br3 = jax.nn.relu(conv3x3(x, w3, b3, DILATIONS[1]))
    br4 = jax.nn.relu(conv3x3(x, w4, b4, DILATIONS[2]))
    gm = jnp.mean(x, axis=(1, 2), keepdims=True)
    g = jax.nn.relu(conv1x1(gm, w5, b5))
    g = jnp.broadcast_to(g, (x.shape[0], H, W, DIM_OUT))
    cat = jnp.concatenate([br1, br2, br3, br4, g], axis=-1)
    res = jax.nn.relu(conv1x1(cat, wc.reshape(5 * DIM_OUT, DIM_OUT), bc))
    return jnp.transpose(res, (0, 3, 1, 2))


if __name__ == "__main__":
    key = jax.random.PRNGKey(0)
    kx, kp = jax.random.split(key)
    x = jax.random.normal(kx, (B, DIM_IN, H, W), jnp.float32)   # NCHW like PyTorch
    params = init_params(kp)
    packed = pack_params(params)

    out = aspp_forward_jit(x, packed)
    out = jax.block_until_ready(out)
    assert out.shape == (B, DIM_OUT, H, W), out.shape

    ref = aspp_reference(x, params)
    if not jnp.allclose(out, ref, atol=2e-3, rtol=2e-3):
        err = float(jnp.max(jnp.abs(out - ref)))
        raise AssertionError(f"kernel/reference mismatch, max abs err {err}")

    print("KERNEL_OK")
</pallas_src>

<mosaic_0001>
module attributes {stable_mosaic.version = 11 : i64} {
  func.func @aspp_kernel(%arg0: memref<128x512xf32, #tpu.memory_space<vmem>>, %arg1: memref<40x128xf32, #tpu.memory_space<vmem>>, %arg2: memref<8x40xf32, #tpu.memory_space<vmem>>, %arg3: memref<8x1xf32, #tpu.memory_space<vmem>>, %arg4: memref<2x8x256xf32, #tpu.memory_space<vmem>>) attributes {dimension_semantics = [], scalar_prefetch = 0 : i64, scratch_operands = 0 : i64, tpu.core_type = #tpu.core_type<tc>} {
    %c0 = arith.constant 0 : index
    %c0_0 = arith.constant 0 : index
    %0 = vector.load %arg0[%c0, %c0_0] : memref<128x512xf32, #tpu.memory_space<vmem>>, vector<128x512xf32>
    %c0_1 = arith.constant 0 : index
    %c0_2 = arith.constant 0 : index
    %1 = vector.load %arg1[%c0_1, %c0_2] : memref<40x128xf32, #tpu.memory_space<vmem>>, vector<40x128xf32>
    %c0_3 = arith.constant 0 : index
    %c0_4 = arith.constant 0 : index
    %2 = vector.load %arg2[%c0_3, %c0_4] : memref<8x40xf32, #tpu.memory_space<vmem>>, vector<8x40xf32>
    %c0_5 = arith.constant 0 : index
    %c0_6 = arith.constant 0 : index
    %3 = vector.load %arg3[%c0_5, %c0_6] : memref<8x1xf32, #tpu.memory_space<vmem>>, vector<8x1xf32>
    %cst = arith.constant dense<0.000000e+00> : vector<40x512xf32>
    %4 = tpu.matmul %1, %0, %cst {dimension_numbers = #tpu.dot_dimension_numbers<[1], [0], [0], [1], [0, 0, 1, 1], [], []>} : vector<40x128xf32>, vector<128x512xf32>, vector<40x512xf32> -> vector<40x512xf32>
    %5 = vector.extract_strided_slice %4 {offsets = [0, 0], sizes = [32, 512], strides = [1, 1]} : vector<40x512xf32> to vector<32x512xf32>
    %cst_7 = arith.constant 0.000000e+00 : f32
    %6 = vector.broadcast %cst_7 : f32 to vector<32x512xf32>
    %7 = arith.maximumf %5, %6 : vector<32x512xf32>
    %8 = vector.extract_strided_slice %4 {offsets = [32, 0], sizes = [8, 512], strides = [1, 1]} : vector<40x512xf32> to vector<8x512xf32>
    %9 = tpu.iota {dimensions = array<i32: 1>} : vector<8x512xi32>
    %cst_8 = arith.constant 0.000000e+00 : f32
    %10 = vector.broadcast %cst_8 : f32 to vector<8x512xf32>
    %11 = vector.extract_strided_slice %8 {offsets = [0, 0], sizes = [8, 256], strides = [1, 1]} : vector<8x512xf32> to vector<8x256xf32>
    %cst_9 = arith.constant dense<0.000000e+00> : vector<8xf32>
    %12 = vector.multi_reduction <add>, %11, %cst_9 [1] : vector<8x256xf32> to vector<8xf32>
    %13 = vector.shape_cast %12 : vector<8xf32> to vector<8x1xf32>
    %cst_10 = arith.constant 2.560000e+02 : f32
    %14 = vector.broadcast %cst_10 : f32 to vector<8x1xf32>
    %15 = arith.divf %13, %14 : vector<8x1xf32>
    %cst_11 = arith.constant 0.000000e+00 : f32
    %16 = vector.broadcast %cst_11 : f32 to vector<8x1xf32>
    %17 = arith.maximumf %15, %16 : vector<8x1xf32>
    %c0_i32 = arith.constant 0 : i32
    %18 = vector.broadcast %c0_i32 : i32 to vector<8x512xi32>
    %19 = arith.cmpi sge, %9, %18 : vector<8x512xi32>
    %c256_i32 = arith.constant 256 : i32
    %20 = vector.broadcast %c256_i32 : i32 to vector<8x512xi32>
    %21 = arith.cmpi slt, %9, %20 : vector<8x512xi32>
    %22 = arith.andi %19, %21 : vector<8x512xi1>
    %23 = vector.shape_cast %17 : vector<8x1xf32> to vector<8x1xf32>
    %24 = vector.broadcast %23 : vector<8x1xf32> to vector<8x512xf32>
    %25 = arith.select %22, %24, %10 : vector<8x512xi1>, vector<8x512xf32>
    %26 = vector.extract_strided_slice %8 {offsets = [0, 256], sizes = [8, 256], strides = [1, 1]} : vector<8x512xf32> to vector<8x256xf32>
    %cst_12 = arith.constant dense<0.000000e+00> : vector<8xf32>
    %27 = vector.multi_reduction <add>, %26, %cst_12 [1] : vector<8x256xf32> to vector<8xf32>
    %28 = vector.shape_cast %27 : vector<8xf32> to vector<8x1xf32>
    %cst_13 = arith.constant 2.560000e+02 : f32
    %29 = vector.broadcast %cst_13 : f32 to vector<8x1xf32>
    %30 = arith.divf %28, %29 : vector<8x1xf32>
    %cst_14 = arith.constant 0.000000e+00 : f32
    %31 = vector.broadcast %cst_14 : f32 to vector<8x1xf32>
    %32 = arith.maximumf %30, %31 : vector<8x1xf32>
    %c256_i32_15 = arith.constant 256 : i32
    %33 = vector.broadcast %c256_i32_15 : i32 to vector<8x512xi32>
    %34 = arith.cmpi sge, %9, %33 : vector<8x512xi32>
    %c512_i32 = arith.constant 512 : i32
    %35 = vector.broadcast %c512_i32 : i32 to vector<8x512xi32>
    %36 = arith.cmpi slt, %9, %35 : vector<8x512xi32>
    %37 = arith.andi %34, %36 : vector<8x512xi1>
    %38 = vector.shape_cast %32 : vector<8x1xf32> to vector<8x1xf32>
    %39 = vector.broadcast %38 : vector<8x1xf32> to vector<8x512xf32>
    %40 = arith.select %37, %39, %25 : vector<8x512xi1>, vector<8x512xf32>
    %41 = tpu.concatenate %7, %40 in 0 : vector<32x512xf32>, vector<8x512xf32> -> vector<40x512xf32>
    %cst_16 = arith.constant dense<0.000000e+00> : vector<8x512xf32>
    %42 = tpu.matmul %2, %41, %cst_16 {dimension_numbers = #tpu.dot_dimension_numbers<[1], [0], [0], [1], [0, 0, 1, 1], [], []>} : vector<8x40xf32>, vector<40x512xf32>, vector<8x512xf32> -> vector<8x512xf32>
    %43 = vector.broadcast %3 : vector<8x1xf32> to vector<8x512xf32>
    %44 = arith.addf %42, %43 : vector<8x512xf32>
    %cst_17 = arith.constant 0.000000e+00 : f32
    %45 = vector.broadcast %cst_17 : f32 to vector<8x512xf32>
    %46 = arith.maximumf %44, %45 : vector<8x512xf32>
    %47 = vector.extract_strided_slice %46 {offsets = [0, 0], sizes = [8, 256], strides = [1, 1]} : vector<8x512xf32> to vector<8x256xf32>
    %c0_18 = arith.constant 0 : index
    %c0_19 = arith.constant 0 : index
    %c0_20 = arith.constant 0 : index
    %48 = vector.load %arg4[%c0_18, %c0_19, %c0_20] : memref<2x8x256xf32, #tpu.memory_space<vmem>>, vector<1x8x256xf32>
    %49 = vector.shape_cast %48 : vector<1x8x256xf32> to vector<8x256xf32>
    %50 = vector.shape_cast %47 : vector<8x256xf32> to vector<1x8x256xf32>
    tpu.vector_store %arg4[%c0_18, %c0_19, %c0_20], %50 {strides = array<i32>} : memref<2x8x256xf32, #tpu.memory_space<vmem>>, vector<1x8x256xf32>,
    %51 = vector.extract_strided_slice %46 {offsets = [0, 256], sizes = [8, 256], strides = [1, 1]} : vector<8x512xf32> to vector<8x256xf32>
    %c1 = arith.constant 1 : index
    %c0_21 = arith.constant 0 : index
    %c0_22 = arith.constant 0 : index
    %52 = vector.load %arg4[%c1, %c0_21, %c0_22] : memref<2x8x256xf32, #tpu.memory_space<vmem>>, vector<1x8x256xf32>
    %53 = vector.shape_cast %52 : vector<1x8x256xf32> to vector<8x256xf32>
    %54 = vector.shape_cast %51 : vector<8x256xf32> to vector<1x8x256xf32>
    tpu.vector_store %arg4[%c1, %c0_21, %c0_22], %54 {strides = array<i32>} : memref<2x8x256xf32, #tpu.memory_space<vmem>>, vector<1x8x256xf32>,
    return
  }
}

</mosaic_0001>

<bundles_post_ra>
// kernel: aspp_forward.1
= control target key start
LH: loop header
LB: loop body
LE: loop exit
PB: predicated region body
PF: predicated region fallthrough
CT: control target
= control target key end

     0   :  { %v594_v3 = vmov 0.0   ;;  %vm347_vm0 = vcmask 326656   ;;  %s858_s0 = inlined_call_operand.vmem [shape: f32[128,512], index: 0, kind: input, shape index: {}]   ;;  %s859_s1 = inlined_call_operand.vmem [shape: f32[40,128], index: 1, kind: input, shape index: {}]   ;;  %s860_s3 = inlined_call_operand.vmem [shape: f32[8,1], index: 3, kind: input, shape index: {}]   ;;  %s861_s2 = inlined_call_operand.vmem [shape: f32[8,40], index: 2, kind: input, shape index: {}]   ;;  %s862_s4 = inlined_call_operand.vmem [shape: f32[2,8,256], index: 4, kind: output, shape index: {}]  }
   0x1   :  { %v18_v0 = vld [vmem:[%s858_s0 + $0x8] sm:$0xff]  ;;  %v20_v2 = vld [vmem:[%s858_s0 + $0x18] sm:$0xff]  ;;  %152 = vmatprep.mubr.f32.mxu0 %v594_v3  ;;  %247 = vmatprep.mubr.f32.mxu1 %v594_v3  ;;  %v17_v6 = vld [vmem:[%s858_s0] sm:$0xff] }
   0x2   :  { %v22_v1 = vld [vmem:[%s858_s0 + $0x28] sm:$0xff]  ;;  %v24_v5 = vld [vmem:[%s858_s0 + $0x38] sm:$0xff]  ;;  %v21_v7 = vld [vmem:[%s858_s0 + $0x20] sm:$0xff] }
   0x3   :  { %v510_v4 = vpack.c.bf16 %v22_v1, %v18_v0  ;;  %v542_v8 = vpack.c.bf16 %v24_v5, %v20_v2  ;;  %v512_v9 = vpack.c.bf16 %v21_v7, %v17_v6  ;;  %v19_v10 = vld [vmem:[%s858_s0 + $0x10] sm:$0xff]  ;;  %v26_v12 = vld [vmem:[%s858_s0 + $0x48] sm:$0xff]  ;;  %v28_v15 = vld [vmem:[%s858_s0 + $0x58] sm:$0xff] }
   0x4   :  { %v23_v11 = vld [vmem:[%s858_s0 + $0x30] sm:$0xff]  ;;  %v30_v14 = vld [vmem:[%s858_s0 + $0x68] sm:$0xff]  ;;  %v32_v16 = vld [vmem:[%s858_s0 + $0x78] sm:$0xff] }
   0x5   :  { %511 = vmatprep.subr.bf16.mxu0 %v510_v4  ;;  %v544_v13 = vpack.c.bf16 %v23_v11, %v19_v10  ;;  %543 = vmatprep.subr.bf16.mxu1 %v542_v8  ;;  %v514_v17 = vpack.c.bf16 %v30_v14, %v26_v12  ;;  %v546_v18 = vpack.c.bf16 %v32_v16, %v28_v15  ;;  %v25_v19 = vld [vmem:[%s858_s0 + $0x40] sm:$0xff]  ;;  %v27_v21 = vld [vmem:[%s858_s0 + $0x50] sm:$0xff]  ;;  %v34_v24 = vld [vmem:[%s858_s0 + $0x88] sm:$0xff] }
   0x6   :  { %513 = vmatpush1.bf16.msra.mxu0 %v512_v9  ;;  %v29_v20 = vld [vmem:[%s858_s0 + $0x60] sm:$0xff]  ;;  %v31_v23 = vld [vmem:[%s858_s0 + $0x70] sm:$0xff]  ;;  %v38_v25 = vld [vmem:[%s858_s0 + $0xa8] sm:$0xff] }
   0x7   :  { %545 = vmatpush1.bf16.msra.mxu1 %v544_v13  ;;  %v516_v22 = vpack.c.bf16 %v29_v20, %v25_v19  ;;  %515 = vmatprep.subr.bf16.mxu0 %v514_v17  ;;  %v548_v26 = vpack.c.bf16 %v31_v23, %v27_v21  ;;  %v518_v27 = vpack.c.bf16 %v38_v25, %v34_v24  ;;  %v36_v28 = vld [vmem:[%s858_s0 + $0x98] sm:$0xff]  ;;  %v33_v30 = vld [vmem:[%s858_s0 + $0x80] sm:$0xff]  ;;  %v35_v33 = vld [vmem:[%s858_s0 + $0x90] sm:$0xff] }
   0x8   :  { %547 = vmatprep.subr.bf16.mxu1 %v546_v18  ;;  %v40_v29 = vld [vmem:[%s858_s0 + $0xb8] sm:$0xff]  ;;  %v37_v32 = vld [vmem:[%s858_s0 + $0xa0] sm:$0xff]  ;;  %v39_v34 = vld [vmem:[%s858_s0 + $0xb0] sm:$0xff] }
   0x9   :  { %v550_v31 = vpack.c.bf16 %v40_v29, %v36_v28  ;;  %v520_v35 = vpack.c.bf16 %v37_v32, %v33_v30  ;;  %v42_v36 = vld [vmem:[%s858_s0 + $0xc8] sm:$0xff]  ;;  %v44_v38 = vld [vmem:[%s858_s0 + $0xd8] sm:$0xff]  ;;  %v552_v39 = vpack.c.bf16 %v39_v34, %v35_v33  ;;  %v41_v42 = vld [vmem:[%s858_s0 + $0xc0] sm:$0xff] }
   0xa   :  { %517 = vmatpush1.bf16.msra.mxu0 %v516_v22  ;;  %v46_v37 = vld [vmem:[%s858_s0 + $0xe8] sm:$0xff]  ;;  %v48_v41 = vld [vmem:[%s858_s0 + $0xf8] sm:$0xff]  ;;  %v45_v43 = vld [vmem:[%s858_s0 + $0xe0] sm:$0xff] }
   0xb   :  { %549 = vmatpush1.bf16.msra.mxu1 %v548_v26  ;;  %519 = vmatprep.subr.bf16.mxu0 %v518_v27  ;;  %v522_v40 = vpack.c.bf16 %v46_v37, %v42_v36  ;;  %v554_v44 = vpack.c.bf16 %v48_v41, %v44_v38  ;;  %v43_v45 = vld [vmem:[%s858_s0 + $0xd0] sm:$0xff]  ;;  %v50_v47 = vld [vmem:[%s858_s0 + $0x108] sm:$0xff]  ;;  %v52_v49 = vld [vmem:[%s858_s0 + $0x118] sm:$0xff]  ;;  %v524_v51 = vpack.c.bf16 %v45_v43, %v41_v42 }
   0xc   :  { %551 = vmatprep.subr.bf16.mxu1 %v550_v31  ;;  %v47_v46 = vld [vmem:[%s858_s0 + $0xf0] sm:$0xff]  ;;  %v54_v48 = vld [vmem:[%s858_s0 + $0x128] sm:$0xff]  ;;  %v56_v50 = vld [vmem:[%s858_s0 + $0x138] sm:$0xff] }
   0xd   :  { %v556_v52 = vpack.c.bf16 %v47_v46, %v43_v45  ;;  %v526_v53 = vpack.c.bf16 %v54_v48, %v50_v47  ;;  %v49_v54 = vld [vmem:[%s858_s0 + $0x100] sm:$0xff]  ;;  %v51_v56 = vld [vmem:[%s858_s0 + $0x110] sm:$0xff]  ;;  %v558_v57 = vpack.c.bf16 %v56_v50, %v52_v49  ;;  %v58_v59 = vld [vmem:[%s858_s0 + $0x148] sm:$0xff] }
   0xe   :  { %521 = vmatpush1.bf16.msra.mxu0 %v520_v35  ;;  %v53_v55 = vld [vmem:[%s858_s0 + $0x120] sm:$0xff]  ;;  %v55_v58 = vld [vmem:[%s858_s0 + $0x130] sm:$0xff]  ;;  %v62_v60 = vld [vmem:[%s858_s0 + $0x168] sm:$0xff] }
   0xf   :  { %553 = vmatpush1.bf16.msra.mxu1 %v552_v39  ;;  %523 = vmatprep.subr.bf16.mxu0 %v522_v40  ;;  %v60_v61 = vld [vmem:[%s858_s0 + $0x158] sm:$0xff]  ;;  %v528_v63 = vpack.c.bf16 %v53_v55, %v49_v54  ;;  %v560_v0 = vpack.c.bf16 %v55_v58, %v51_v56  ;;  %v530_v1 = vpack.c.bf16 %v62_v60, %v58_v59  ;;  %v57_v2 = vld [vmem:[%s858_s0 + $0x140] sm:$0xff]  ;;  %v59_v5 = vld [vmem:[%s858_s0 + $0x150] sm:$0xff] }
  0x10   :  { %555 = vmatprep.subr.bf16.mxu1 %v554_v44  ;;  %v64_v62 = vld [vmem:[%s858_s0 + $0x178] sm:$0xff]  ;;  %v61_v4 = vld [vmem:[%s858_s0 + $0x160] sm:$0xff]  ;;  %v63_v7 = vld [vmem:[%s858_s0 + $0x170] sm:$0xff] }
  0x11   :  { %v562_v6 = vpack.c.bf16 %v64_v62, %v60_v61  ;;  %v66_v8 = vld [vmem:[%s858_s0 + $0x188] sm:$0xff]  ;;  %v68_v10 = vld [vmem:[%s858_s0 + $0x198] sm:$0xff]  ;;  %v532_v12 = vpack.c.bf16 %v61_v4, %v57_v2  ;;  %v564_v13 = vpack.c.bf16 %v63_v7, %v59_v5  ;;  %v65_v15 = vld [vmem:[%s858_s0 + $0x180] sm:$0xff] }
  0x12   :  { %525 = vmatpush1.bf16.msra.mxu0 %v524_v51  ;;  %v70_v9 = vld [vmem:[%s858_s0 + $0x1a8] sm:$0xff]  ;;  %v72_v11 = vld [vmem:[%s858_s0 + $0x1b8] sm:$0xff]  ;;  %v69_v16 = vld [vmem:[%s858_s0 + $0x1a0] sm:$0xff] }
  0x13   :  { %557 = vmatpush1.bf16.msra.mxu1 %v556_v52  ;;  %527 = vmatprep.subr.bf16.mxu0 %v526_v53  ;;  %v534_v14 = vpack.c.bf16 %v70_v9, %v66_v8  ;;  %v67_v17 = vld [vmem:[%s858_s0 + $0x190] sm:$0xff]  ;;  %v566_v18 = vpack.c.bf16 %v72_v11, %v68_v10  ;;  %v74_v20 = vld [vmem:[%s858_s0 + $0x1c8] sm:$0xff]  ;;  %v76_v22 = vld [vmem:[%s858_s0 + $0x1d8] sm:$0xff]  ;;  %v536_v24 = vpack.c.bf16 %v69_v16, %v65_v15 }
  0x14   :  { %559 = vmatprep.subr.bf16.mxu1 %v558_v57  ;;  %v71_v19 = vld [vmem:[%s858_s0 + $0x1b0] sm:$0xff]  ;;  %v78_v21 = vld [vmem:[%s858_s0 + $0x1e8] sm:$0xff]  ;;  %v80_v23 = vld [vmem:[%s858_s0 + $0x1f8] sm:$0xff] }
  0x15   :  { %v568_v25 = vpack.c.bf16 %v71_v19, %v67_v17  ;;  %v538_v26 = vpack.c.bf16 %v78_v21, %v74_v20  ;;  %v73_v27 = vld [vmem:[%s858_s0 + $0x1c0] sm:$0xff]  ;;  %v570_v29 = vpack.c.bf16 %v80_v23, %v76_v22  ;;  %v75_v30 = vld [vmem:[%s858_s0 + $0x1d0] sm:$0xff]  ;;  %v82_v35 = vld [vmem:[%s859_s1 + $0x8] sm:$0xff]  ;;  %v595_v21 = vmov 0  }
  0x16   :  { %529 = vmatpush1.bf16.msra.mxu0 %v528_v63  ;;  %v77_v28 = vld [vmem:[%s858_s0 + $0x1e0] sm:$0xff]  ;;  %v79_v31 = vld [vmem:[%s858_s0 + $0x1f0] sm:$0xff]  ;;  %v84_v37 = vld [vmem:[%s859_s1 + $0x18] sm:$0xff]  ;;  %592 = vset.pattern.permute.xlu1 %v595_v21 }
  0x17   :  { %561 = vmatpush1.bf16.msra.mxu1 %v560_v0  ;;  %531 = vmatprep.subr.bf16.mxu0 %v530_v1  ;;  %v540_v32 = vpack.c.bf16 %v77_v28, %v73_v27  ;;  %v572_v33 = vpack.c.bf16 %v79_v31, %v75_v30  ;;  %v81_v34 = vld [vmem:[%s859_s1] sm:$0xff]  ;;  %v83_v36 = vld [vmem:[%s859_s1 + $0x10] sm:$0xff] }
  0x18   :  { %563 = vmatprep.subr.bf16.mxu1 %v562_v6  ;;  %v85_v38 = vld [vmem:[%s859_s1 + $0x20] sm:$0xff]  ;;  %593 = vset.pattern.permute.xlu0 %v595_v21 }
  0x19   :  { %v87_v22 = vld [vmem:[%s860_s3] sm:$0xff] }
  0x1a   :  { %533 = vmatpush1.bf16.msra.mxu0 %v532_v12  ;;  %344 = vperm.xlu1 %592, %v87_v22   ;;  %v86_v27 = vld [vmem:[%s861_s2] sm:$0xff] }
  0x1b   :  { %565 = vmatpush1.bf16.msra.mxu1 %v564_v13  ;;  %535 = vmatprep.subr.bf16.mxu0 %v534_v14 }
  0x1c   :  { %567 = vmatprep.subr.bf16.mxu1 %v566_v18 }
  0x1e   :  { %537 = vmatpush1.bf16.msra.mxu0 %v536_v24 }
  0x1f   :  { %569 = vmatpush1.bf16.msra.mxu1 %v568_v25  ;;  %539 = vmatprep.subr.bf16.mxu0 %v538_v26 }
  0x20   :  { %571 = vmatprep.subr.bf16.mxu1 %v570_v29 }
  0x22   :  { %541 = vmatpush1.bf16.msra.mxu0 %v540_v32 }
  0x23   :  { %573 = vmatpush1.bf16.msra.mxu1 %v572_v33 }
  0x25   :  { %153 = vmatmul.mubr.f32.vlgmr.msra.gmra.mrb[0].mxu0 %v81_v34 }
  0x26   :  { %248 = vmatmul.mubr.f32.vlgmr.msra.gmra.mrb[0].mxu1 %v81_v34  ;;  %158 = vmatprep.mubr.f32.mxu0 %v594_v3 }
  0x27   :  { %253 = vmatprep.mubr.f32.mxu1 %v594_v3 }
  0x29   :  { %159 = vmatmul.mubr.f32.gmra.mrb[2].mxu0 %v82_v35 }
  0x2a   :  { %254 = vmatmul.mubr.f32.gmra.mrb[2].mxu1 %v82_v35  ;;  %164 = vmatprep.mubr.f32.mxu0 %v594_v3 }
  0x2b   :  { %259 = vmatprep.mubr.f32.mxu1 %v594_v3 }
  0x2d   :  { %165 = vmatmul.mubr.f32.gmra.mrb[4].mxu0 %v83_v36 }
  0x2e   :  { %260 = vmatmul.mubr.f32.gmra.mrb[4].mxu1 %v83_v36  ;;  %170 = vmatprep.mubr.f32.mxu0 %v594_v3 }
  0x2f   :  { %265 = vmatprep.mubr.f32.mxu1 %v594_v3 }
  0x31   :  { %171 = vmatmul.mubr.f32.gmra.mrb[6].mxu0 %v84_v37 }
  0x32   :  { %266 = vmatmul.mubr.f32.gmra.mrb[6].mxu1 %v84_v37  ;;  %176 = vmatprep.mubr.f32.mxu0 %v594_v3 }
  0x33   :  { %271 = vmatprep.mubr.f32.mxu1 %v594_v3 }
  0x35   :  { %177 = vmatmul.mubr.f32.gmra.mrb[8].mxu0 %v85_v38 }
  0x36   :  { %272 = vmatmul.mubr.f32.gmra.mrb[8].mxu1 %v85_v38  ;;  %415 = vmatprep.mubr.f32.mxu0 %v594_v3 }
  0x37   :  { %486 = vmatprep.mubr.f32.mxu1 %v594_v3 }
  0x99   :  { %v345_v30 = vpop.permute.xlu1 %344 }
  0xf8   :  { %v154_v39 = vpop.f32.mrb[0].mxu0 }
  0xf9   :  { %v156_v40 = vpop.f32.mrb[1].mxu0  ;;  %v249_v41 = vpop.f32.mrb[0].mxu1  ;;  %v278_v45 = vmax.f32 %v154_v39, 0.0 }
  0xfa   :  { %v251_v42 = vpop.f32.mrb[1].mxu1  ;;  %v280_v43 = vmax.f32 %v249_v41, 0.0  ;;  %v279_v50 = vmax.f32 %v156_v40, 0.0 }
  0xfb   :  { %v281_v46 = vmax.f32 %v251_v42, 0.0 }
  0xfc   :  { %v160_v44 = vpop.f32.mrb[2].mxu0 }
  0xfd   :  { %v282_v47 = vmax.f32 %v160_v44, 0.0  ;;  %v255_v48 = vpop.f32.mrb[2].mxu1  ;;  %v162_v49 = vpop.f32.mrb[3].mxu0 }
  0xfe   :  { %v284_v51 = vmax.f32 %v255_v48, 0.0  ;;  %v283_v52 = vmax.f32 %v162_v49, 0.0  ;;  %v257_v53 = vpop.f32.mrb[3].mxu1 }
  0xff   :  { %v576_v54 = vpack.c.bf16 %v282_v47, %v278_v45  ;;  %v285_v55 = vmax.f32 %v257_v53, 0.0 }
 0x100   :  { %v584_v56 = vpack.c.bf16 %v284_v51, %v280_v43  ;;  %v574_v57 = vpack.c.bf16 %v283_v52, %v279_v50  ;;  %v166_v3 = vpop.f32.mrb[4].mxu0 }
 0x101   :  { %v582_v58 = vpack.c.bf16 %v285_v55, %v281_v46  ;;  %v168_v59 = vpop.f32.mrb[5].mxu0  ;;  %v261_v60 = vpop.f32.mrb[4].mxu1  ;;  %v286_v0 = vmax.f32 %v166_v3, 0.0 }
 0x102   :  { %575 = vmatprep.subr.bf16.mxu0 %v574_v57  ;;  %v263_v61 = vpop.f32.mrb[5].mxu1  ;;  %v288_v62 = vmax.f32 %v261_v60, 0.0  ;;  %v287_v6 = vmax.f32 %v168_v59, 0.0 }
 0x103   :  { %583 = vmatprep.subr.bf16.mxu1 %v582_v58  ;;  %577 = vmatpush1.bf16.msra.mxu0 %v576_v54  ;;  %v289_v1 = vmax.f32 %v263_v61, 0.0 }
 0x104   :  { %585 = vmatpush1.bf16.msra.mxu1 %v584_v56  ;;  %v172_v63 = vpop.f32.mrb[6].mxu0 }
 0x105   :  { %v290_v2 = vmax.f32 %v172_v63, 0.0  ;;  %v267_v4 = vpop.f32.mrb[6].mxu1  ;;  %v174_v5 = vpop.f32.mrb[7].mxu0 }
 0x106   :  { %v292_v7 = vmax.f32 %v267_v4, 0.0  ;;  %v291_v8 = vmax.f32 %v174_v5, 0.0  ;;  %v269_v9 = vpop.f32.mrb[7].mxu1 }
 0x107   :  { %v580_v10 = vpack.c.bf16 %v290_v2, %v286_v0  ;;  %v293_v11 = vmax.f32 %v269_v9, 0.0 }
 0x108   :  { %v588_v12 = vpack.c.bf16 %v292_v7, %v288_v62  ;;  %v578_v13 = vpack.c.bf16 %v291_v8, %v287_v6  ;;  %v178_v14 = vpop.f32.mrb[8].mxu0 }
 0x109   :  { %v586_v15 = vpack.c.bf16 %v293_v11, %v289_v1  ;;  %v180_v16 = vpop.f32.mrb[9].mxu0  ;;  %v273_v17 = vpop.f32.mrb[8].mxu1 }
 0x10a   :  { %579 = vmatprep.subr.bf16.mxu0 %v578_v13  ;;  %v275_v18 = vpop.f32.mrb[9].mxu1  ;;  %v299_v19 = vadd.f32 %v180_v16, %v178_v14 }
 0x10b   :  { %587 = vmatprep.subr.bf16.mxu1 %v586_v15  ;;  %581 = vmatpush1.bf16.msra.mxu0 %v580_v10  ;;  %v321_v20 = vadd.f32 %v275_v18, %v273_v17 }
 0x10c   :  { %589 = vmatpush1.bf16.msra.mxu1 %v588_v12  ;;  %300 = vadd.xlane.f32.xlu0 %v299_v19 }
 0x110   :  { %322 = vadd.xlane.f32.xlu0 %v321_v20 }
 0x199   :  { %v301_v23 = vpop.xlane.xlu0 %300 }
 0x19a   :  { %v303_v24 = vmul.f32 0.00390625, %v301_v23 }
 0x19c   :  { %v304_v25 = vmax.f32 %v303_v24, 0.0 }
 0x19d   :  { %v323_v26 = vpop.xlane.xlu0 %322 }
 0x19e   :  { %v324_v28 = vmul.f32 0.00390625, %v323_v26  ;;  %359 = vmatprep.subr.mxu0 %v304_v25 }
 0x19f   :  { %360 = vmatpush1.msra.mxu0 %v304_v25 }
 0x1a0   :  { %v325_v29 = vmax.f32 %v324_v28, 0.0  ;;  %506 = vmatmul.mubr.msk.f32.vlgmr.msra.gmra.mrb[10].mxu0 %vm347_vm0, %v86_v27 }
 0x1a2   :  { %430 = vmatprep.subr.mxu1 %v325_v29 }
 0x1a3   :  { %431 = vmatpush1.msra.mxu1 %v325_v29 }
 0x1a4   :  { %507 = vmatmul.mubr.msk.f32.vlgmr.msra.gmra.mrb[10].mxu1 %vm347_vm0, %v86_v27 }
 0x273   :  { %v417_v31 = vpop.f32.mrb[10].mxu0 }
 0x274   :  { %v418_v32 = vadd.f32 %v417_v31, %v345_v30  ;;  %v419_v33 = vpop.f32.mrb[11].mxu0 }
 0x275   :  { %v420_v34 = vadd.f32 %v419_v33, %v345_v30 }
 0x276   :  { %v493_v35 = vmax.f32 %v418_v32, 0.0 }
 0x277   :  { %v488_v36 = vpop.f32.mrb[10].mxu1  ;;  %v494_v37 = vmax.f32 %v420_v34, 0.0 }
 0x278   :  { %v489_v38 = vadd.f32 %v488_v36, %v345_v30  ;;  %497 = vst [vmem:[%s862_s4] sm:$0xff] %v493_v35  ;;  %v490_v39 = vpop.f32.mrb[11].mxu1 }
 0x279   :  { %498 = vst [vmem:[%s862_s4 + $0x8] sm:$0xff] %v494_v37  ;;  %v491_v40 = vadd.f32 %v490_v39, %v345_v30 }
 0x27a   :  { %v495_v41 = vmax.f32 %v489_v38, 0.0 }
 0x27b   :  { %v496_v42 = vmax.f32 %v491_v40, 0.0 }
 0x27c   :  { %508 = vst [vmem:[%s862_s4 + $0x10] sm:$0xff] %v495_v41 }
 0x27d   :  { %509 = vst [vmem:[%s862_s4 + $0x18] sm:$0xff] %v496_v42 }

</bundles_post_ra>
